<compile_context>
chip_gen: v7x
topology: tpu7x:2x2x1
jax: 0.10.0
libtpu: 0.0.40
codegen_flags: <defaults>
</compile_context>

<pallas_src>
import math
import functools

import jax
import jax.numpy as jnp
from jax import lax
from jax.experimental import pallas as pl
from jax.experimental.pallas import tpu as pltpu

BF16 = jnp.bfloat16


# ----------------------------------------------------------------------------
# In-kernel helpers
# ----------------------------------------------------------------------------

def _layer_norm(x, g, b, eps=1e-5):
    """torch.nn.LayerNorm over the last axis (g, b broadcast from (1, H))."""
    mu = jnp.mean(x, axis=-1, keepdims=True)
    var = jnp.mean(jnp.square(x - mu), axis=-1, keepdims=True)
    return (x - mu) * lax.rsqrt(var + eps) * g + b


# ----------------------------------------------------------------------------
# Fused decoder stack kernel: 4 x DiffLayer + W_out in one pallas_call.
# grid = (B, n_layers); per-layer weights indexed with the layer axis, x is
# carried across layers in a VMEM scratch, output written at the last layer.
# ----------------------------------------------------------------------------

def _decoder_stack_kernel(x_ref, emb_ref,
                          convw_ref, convb_ref, n1g_ref, n1b_ref,
                          wq_ref, wkv_ref, wo_ref, lng_ref, lnb_ref,
                          linx_ref, line_ref, linb_ref, n2g_ref, n2b_ref,
                          wout_ref, woutb_ref,
                          o_ref, x_scr):
    layer = pl.program_id(1)
    n_layers = pl.num_programs(1)
    L, H = x_scr.shape
    n_strips = wq_ref.shape[1]
    strip = wq_ref.shape[3]
    r = n_strips * strip

    # Load carried activation (initialised from the input at the first layer).
    @pl.when(layer == 0)
    def _():
        x_scr[...] = x_ref[0]

    x = x_scr[...]                                   # (L, H) f32
    emb = emb_ref[0]                                 # (L, H) f32
    emb_bf = emb.astype(BF16)

    # ---- Conv1d(H, H, 3, padding=1), channels-last. Sequence shifts are two
    # tiny MXU matmuls against iota-built shift matrices (avoids the sublane-
    # misaligned xp[1:L+1]/xp[2:L+2] slices flagged by the review, no XLU).
    ii = lax.broadcasted_iota(jnp.int32, (L, L), 0)
    jj = lax.broadcasted_iota(jnp.int32, (L, L), 1)
    sh_prev = jnp.where(jj == ii - 1, 1.0, 0.0).astype(BF16)   # picks x[t-1], 0 at t=0
    sh_next = jnp.where(jj == ii + 1, 1.0, 0.0).astype(BF16)   # picks x[t+1], 0 at t=L-1
    x_bf = x.astype(BF16)
    x_prev = jnp.dot(sh_prev, x_bf, preferred_element_type=jnp.float32).astype(BF16)
    x_next = jnp.dot(sh_next, x_bf, preferred_element_type=jnp.float32).astype(BF16)
    cw = convw_ref[0]                                # (3H, H) bf16: [Wk0^T; Wk1^T; Wk2^T]
    y = jnp.dot(x_prev, cw[0:H, :], preferred_element_type=jnp.float32)
    y = y + jnp.dot(x_bf, cw[H:2 * H, :], preferred_element_type=jnp.float32)
    y = y + jnp.dot(x_next, cw[2 * H:3 * H, :], preferred_element_type=jnp.float32)
    y = y + convb_ref[0]

    # norm1(relu(conv(x)))
    x1 = _layer_norm(jnp.maximum(y, 0.0), n1g_ref[0], n1b_ref[0])
    x1_bf = x1.astype(BF16)

    # K / V from embeddings via one fused (H, 2r) bf16 matmul.
    kv = jnp.dot(emb_bf, wkv_ref[0], preferred_element_type=jnp.float32)
    k_bf = kv[:, :r].astype(BF16)
    v_bf = kv[:, r:].astype(BF16)

    # ---- _naive_attn: scores are (r, r) with L as the contraction axis and
    # softmax over the last (k-feature) axis — verified against the torch bmm
    # ordering.  Strip-tiled over q-feature rows (strips are independent, so
    # the softmax is exact per strip); proj_out folded into the strip loop so
    # the full (L, r) context is never materialised.  1/sqrt(r) folded in Wq.
    def strip_body(i, acc):
        wq_s = wq_ref[0, i]                                            # (H, strip) bf16
        q_s = jnp.dot(x1_bf, wq_s,
                      preferred_element_type=jnp.float32).astype(BF16)  # (L, strip)
        s = lax.dot_general(q_s, k_bf, (((0,), (0,)), ((), ())),
                            preferred_element_type=jnp.float32)         # (strip, r)
        s = s - jnp.max(s, axis=-1, keepdims=True)
        e = jnp.exp(s)       # f32 exp (kept f32: no bf16 EUP on v5e)
        # Denominator >= 1 after max-subtraction -> approx reciprocal is benign.
        p_bf = (e * pl.reciprocal(jnp.sum(e, axis=-1, keepdims=True),
                                  approx=True)).astype(BF16)
        ctx_s = lax.dot_general(v_bf, p_bf, (((1,), (1,)), ((), ())),
                                preferred_element_type=jnp.float32).astype(BF16)  # (L, strip)
        wo_s = wo_ref[0, i]                                            # (strip, H) bf16
        return acc + jnp.dot(ctx_s, wo_s, preferred_element_type=jnp.float32)

    proj = lax.fori_loop(0, n_strips, strip_body, jnp.zeros((L, H), jnp.float32))

    # ln_attn(embeddings + proj_out(context))
    extracted = _layer_norm(emb + proj, lng_ref[0], lnb_ref[0])

    # linear(cat([x1, extracted])) as two split-weight bf16 matmuls.
    y2 = (jnp.dot(x1_bf, linx_ref[0], preferred_element_type=jnp.float32)
          + jnp.dot(extracted.astype(BF16), line_ref[0],
                    preferred_element_type=jnp.float32)
          + linb_ref[0])
    # TODO(synk): Dropout(0.1) omitted (inference -> identity).
    x_new = _layer_norm(jnp.maximum(y2, 0.0), n2g_ref[0], n2b_ref[0])
    x_scr[...] = x_new

    # Final W_out projection fused into the last layer step.
    @pl.when(layer == n_layers - 1)
    def _():
        o_ref[0] = (jnp.dot(x_new.astype(BF16), wout_ref[...],
                            preferred_element_type=jnp.float32) + woutb_ref[...])


def decoder_stack_forward(p, x, embeddings):
    """All DiffLayers + W_out in a single fused pallas_call.

    x: (B, L, H), embeddings: (1, L, H) -> logits (B, L, 21).
    """
    B, L, H = x.shape
    dl = p["decoder"]
    NL = dl["conv_w"].shape[0]
    n_strips, strip = dl["wq"].shape[1], dl["wq"].shape[3]
    r = n_strips * strip
    N_out = p["W_out_wt"].shape[1]

    lspec3 = lambda s: pl.BlockSpec((1,) + s, lambda b, l: (l, 0, 0))
    lspec4 = lambda s: pl.BlockSpec((1,) + s, lambda b, l: (l, 0, 0, 0))
    cspec = lambda s: pl.BlockSpec(s, lambda b, l, _n=None: (0,) * len(s))

    in_specs = [
        pl.BlockSpec((1, L, H), lambda b, l: (b, 0, 0)),   # x (per batch)
        cspec((1, L, H)),                                  # embeddings (shared)
        lspec3((3 * H, H)),                                # conv weight (stacked)
        lspec3((1, H)), lspec3((1, H)), lspec3((1, H)),    # conv_b, norm1 g/b
        lspec4((n_strips, H, strip)),                      # Wq (strips)
        lspec3((H, 2 * r)),                                # fused Wk|Wv
        lspec4((n_strips, strip, H)),                      # Wo (strips)
        lspec3((1, H)), lspec3((1, H)),                    # ln_attn g/b
        lspec3((H, H)), lspec3((H, H)), lspec3((1, H)),    # linear x/e halves + bias
        lspec3((1, H)), lspec3((1, H)),                    # norm2 g/b
        cspec((H, N_out)), cspec((1, N_out)),              # W_out (shared)
    ]
    return pl.pallas_call(
        _decoder_stack_kernel,
        grid=(B, NL),
        in_specs=in_specs,
        out_specs=pl.BlockSpec((1, L, N_out), lambda b, l: (b, 0, 0)),
        out_shape=jax.ShapeDtypeStruct((B, L, N_out), jnp.float32),
        scratch_shapes=[pltpu.VMEM((L, H), jnp.float32)],
        compiler_params=pltpu.CompilerParams(
            dimension_semantics=("parallel", "arbitrary"),
            vmem_limit_bytes=32 * 1024 * 1024),
    )(x.astype(jnp.float32), embeddings.astype(jnp.float32),
      dl["conv_w"], dl["conv_b"], dl["norm1_g"], dl["norm1_b"],
      dl["wq"], dl["wkv"], dl["wo"], dl["ln_attn_g"], dl["ln_attn_b"],
      dl["lin_wx"], dl["lin_we"], dl["lin_b"], dl["norm2_g"], dl["norm2_b"],
      p["W_out_wt"], p["W_out_b"])


# ----------------------------------------------------------------------------
# Fused integrate_embeddings kernel (per-state matmuls batched to (S*L, .)).
# ----------------------------------------------------------------------------

def _integrate_kernel(hv_ref, hexv_ref, cw_ref, cb_ref,
                      gwv_ref, gwe_ref, gb_ref,
                      cwl_ref, cwc_ref, combb_ref, o_ref, *, num_states):
    SL, H = hv_ref.shape
    L = SL // num_states

    # Batched across states: one collect matmul + one pair of graph matmuls.
    collected = (jnp.dot(hexv_ref[...].astype(BF16), cw_ref[...],
                         preferred_element_type=jnp.float32) + cb_ref[...])
    h_all = (jnp.dot(hv_ref[...].astype(BF16), gwv_ref[...],
                     preferred_element_type=jnp.float32)
             + jnp.dot(collected.astype(BF16), gwe_ref[...],
                       preferred_element_type=jnp.float32)
             + gb_ref[...])                                  # (S*L, H)

    # ratio[0] == 0 in the torch code -> state 0 contributes nothing.
    acc = jnp.zeros((L, H), jnp.float32)
    for s in range(1, num_states):                           # tiny static loop (S-1)
        last = h_all[(s - 1) * L:s * L, :]
        cur = h_all[s * L:(s + 1) * L, :]
        ratio = (jnp.dot(last.astype(BF16), cwl_ref[...],
                         preferred_element_type=jnp.float32)
                 + jnp.dot(cur.astype(BF16), cwc_ref[...],
                           preferred_element_type=jnp.float32)
                 + combb_ref[...])
        # Exact division (torch reference: ratio / (sum + 1e-8)); the divisor
        # is a signed sum near zero, so no approx reciprocal here.
        ratio = ratio / (jnp.sum(ratio, axis=-1, keepdims=True) + 1e-8)
        acc = acc + ratio * cur
    o_ref[0] = acc


def integrate_embeddings(p, h_V, h_EXV):
    """diffmodel.integrate_embeddings. h_V: (S, L, H), h_EXV: (S, L, k, EXV)."""
    S, L, H = h_V.shape
    Kp = p["k_neighbors"] * p["EXV_dim"]
    hexv = h_EXV.reshape(S, L, -1)
    hexv = jnp.pad(hexv, ((0, 0), (0, 0), (0, Kp - hexv.shape[2])))
    return pl.pallas_call(
        functools.partial(_integrate_kernel, num_states=S),
        out_shape=jax.ShapeDtypeStruct((1, L, H), jnp.float32),
    )(h_V.reshape(S * L, H).astype(jnp.float32),
      hexv.reshape(S * L, Kp).astype(jnp.float32),
      p["collect_wt"], p["collect_b"],
      p["graph_wv"], p["graph_we"], p["graph_b"],
      p["comb_wl"], p["comb_wc"], p["comb_b"])


# ----------------------------------------------------------------------------
# Deterministic parameter init (xavier_uniform for dim>1, zeros for biases).
# Weights are generated in torch layout (matching fan-in/out), then transposed
# / stacked / strip-reshaped / bf16-cast ONCE here into compute layout.
# ----------------------------------------------------------------------------

def xavier(key, shape):
    if len(shape) == 3:            # Conv1d weight (Cout, Cin, k)
        fan_out = shape[0] * shape[2]
        fan_in = shape[1] * shape[2]
    else:                          # Linear / Embedding (out, in)
        fan_out, fan_in = shape[0], shape[1]
    bound = math.sqrt(6.0 / (fan_in + fan_out))
    return jax.random.uniform(key, shape, jnp.float32, -bound, bound)


def init_diff_layer(key, H, rank, strip):
    r = rank * H
    assert r % strip == 0
    n_strips = r // strip
    ks = jax.random.split(key, 6)
    conv_w = xavier(ks[0], (H, H, 3))                 # torch (Cout, Cin, K)
    wq = xavier(ks[1], (r, H))
    wk = xavier(ks[2], (r, H))
    wv = xavier(ks[3], (r, H))
    wo = xavier(ks[4], (H, r))
    lin_w = xavier(ks[5], (H, 2 * H))
    scale = 1.0 / math.sqrt(r)                        # _naive_attn scale, folded into Wq
    wq_strips = (wq.T * scale).reshape(H, n_strips, strip).transpose(1, 0, 2)
    wo_strips = wo.T.reshape(n_strips, strip, H)
    return dict(
        conv_w=jnp.concatenate([conv_w[:, :, k].T for k in range(3)],
                               axis=0).astype(BF16),          # (3H, H)
        conv_b=jnp.zeros((1, H), jnp.float32),
        wq=wq_strips.astype(BF16),                            # (n_strips, H, strip)
        wkv=jnp.concatenate([wk.T, wv.T], axis=1).astype(BF16),  # (H, 2r)
        wo=wo_strips.astype(BF16),                            # (n_strips, strip, H)
        ln_attn_g=jnp.ones((1, H), jnp.float32),
        ln_attn_b=jnp.zeros((1, H), jnp.float32),
        lin_wx=lin_w[:, :H].T.astype(BF16),                   # (H, H) half for x_orig
        lin_we=lin_w[:, H:].T.astype(BF16),                   # (H, H) half for extracted
        lin_b=jnp.zeros((1, H), jnp.float32),
        norm1_g=jnp.ones((1, H), jnp.float32),
        norm1_b=jnp.zeros((1, H), jnp.float32),
        norm2_g=jnp.ones((1, H), jnp.float32),
        norm2_b=jnp.zeros((1, H), jnp.float32),
    )


def init_params(key, H, EXV_dim, k_neighbors, rank, TOTAL_DIM, NUM_DIFF_STEPS,
                maxlen, n_layers=4, strip=128):
    strip = min(strip, rank * H)
    ks = jax.random.split(key, 8 + n_layers)
    collect_w = xavier(ks[0], (H, EXV_dim * k_neighbors))
    comb_w = xavier(ks[1], (H, 2 * H))
    graph_w = xavier(ks[2], (H, 2 * H))
    layers = [init_diff_layer(ks[8 + i], H, rank, strip) for i in range(n_layers)]
    decoder = {k: jnp.stack([lp[k] for lp in layers], axis=0) for k in layers[0]}
    return dict(
        k_neighbors=k_neighbors, EXV_dim=EXV_dim,
        collect_wt=collect_w.T.astype(BF16),                  # (k*EXV, H)
        collect_b=jnp.zeros((1, H), jnp.float32),
        graph_wv=graph_w[:, :H].T.astype(BF16),
        graph_we=graph_w[:, H:].T.astype(BF16),
        graph_b=jnp.zeros((1, H), jnp.float32),
        comb_wl=comb_w[:, :H].T.astype(BF16),
        comb_wc=comb_w[:, H:].T.astype(BF16),
        comb_b=jnp.zeros((1, H), jnp.float32),
        seq_enc=xavier(ks[3], (TOTAL_DIM, H)),
        W_out_wt=xavier(ks[4], (21, H)).T.astype(BF16),       # (H, 21)
        W_out_b=jnp.zeros((1, 21), jnp.float32),
        t_embed=xavier(ks[5], (NUM_DIFF_STEPS, H)),
        pos_embed=xavier(ks[6], (maxlen, H)),
        decoder=decoder,
    )


# ----------------------------------------------------------------------------
# Demo
# ----------------------------------------------------------------------------

if __name__ == "__main__":
    H = 32            # hidden_dim
    EXV_dim = 8
    k_neighbors = 4
    rank = 16         # -> r = rank * H = 512
    S = 3             # number of states
    L = 8             # sequence length
    TOTAL_DIM = 22
    NUM_DIFF_STEPS = 50
    maxlen = 64

    key = jax.random.PRNGKey(0)
    kp, k1, k2, k3 = jax.random.split(key, 4)
    params = init_params(kp, H, EXV_dim, k_neighbors, rank,
                         TOTAL_DIM, NUM_DIFF_STEPS, maxlen, n_layers=4)

    h_V = jax.random.normal(k1, (S, L, H), jnp.float32)
    h_EXV = jax.random.normal(k2, (S, L, 3, EXV_dim), jnp.float32)  # 3 < k_neighbors -> exercises pad
    tokens = jax.random.randint(k3, (L,), 0, TOTAL_DIM)
    t_step = 7

    # integrate_embeddings (exact semantics, single fused kernel)
    embeddings = integrate_embeddings(params, h_V, h_EXV)           # (1, L, H)

    # decoder-style pass (top-level forward is NotImplementedError in source)
    x = (params["seq_enc"][tokens][None, :, :]
         + params["pos_embed"][:L][None, :, :]
         + params["t_embed"][t_step][None, None, :])
    logits = decoder_stack_forward(params, x, embeddings)           # ONE fused kernel

    jax.block_until_ready(logits)
    assert logits.shape == (1, L, 21)
    assert bool(jnp.all(jnp.isfinite(logits)))
    print("KERNEL_OK")
</pallas_src>

<mosaic_0001>
module attributes {stable_mosaic.version = 11 : i64} {
  func.func @_integrate_kernel(%arg0: memref<24x32xf32, #tpu.memory_space<vmem>>, %arg1: memref<24x32xf32, #tpu.memory_space<vmem>>, %arg2: memref<32x32xbf16, #tpu.memory_space<vmem>>, %arg3: memref<1x32xf32, #tpu.memory_space<vmem>>, %arg4: memref<32x32xbf16, #tpu.memory_space<vmem>>, %arg5: memref<32x32xbf16, #tpu.memory_space<vmem>>, %arg6: memref<1x32xf32, #tpu.memory_space<vmem>>, %arg7: memref<32x32xbf16, #tpu.memory_space<vmem>>, %arg8: memref<32x32xbf16, #tpu.memory_space<vmem>>, %arg9: memref<1x32xf32, #tpu.memory_space<vmem>>, %arg10: memref<1x8x32xf32, #tpu.memory_space<vmem>>) attributes {dimension_semantics = [], scalar_prefetch = 0 : i64, scratch_operands = 0 : i64, tpu.core_type = #tpu.core_type<tc>} {
    %c0 = arith.constant 0 : index
    %c0_0 = arith.constant 0 : index
    %0 = vector.load %arg1[%c0, %c0_0] : memref<24x32xf32, #tpu.memory_space<vmem>>, vector<24x32xf32>
    %1 = arith.truncf %0 : vector<24x32xf32> to vector<24x32xbf16>
    %c0_1 = arith.constant 0 : index
    %c0_2 = arith.constant 0 : index
    %2 = vector.load %arg2[%c0_1, %c0_2] : memref<32x32xbf16, #tpu.memory_space<vmem>>, vector<32x32xbf16>
    %cst = arith.constant dense<0.000000e+00> : vector<24x32xf32>
    %3 = tpu.matmul %1, %2, %cst {dimension_numbers = #tpu.dot_dimension_numbers<[1], [0], [0], [1], [0, 0, 1, 1], [], []>} : vector<24x32xbf16>, vector<32x32xbf16>, vector<24x32xf32> -> vector<24x32xf32>
    %c0_3 = arith.constant 0 : index
    %c0_4 = arith.constant 0 : index
    %4 = vector.load %arg3[%c0_3, %c0_4] : memref<1x32xf32, #tpu.memory_space<vmem>>, vector<1x32xf32>
    %5 = vector.broadcast %4 : vector<1x32xf32> to vector<24x32xf32>
    %6 = arith.addf %3, %5 : vector<24x32xf32>
    %c0_5 = arith.constant 0 : index
    %c0_6 = arith.constant 0 : index
    %7 = vector.load %arg0[%c0_5, %c0_6] : memref<24x32xf32, #tpu.memory_space<vmem>>, vector<24x32xf32>
    %8 = arith.truncf %7 : vector<24x32xf32> to vector<24x32xbf16>
    %c0_7 = arith.constant 0 : index
    %c0_8 = arith.constant 0 : index
    %9 = vector.load %arg4[%c0_7, %c0_8] : memref<32x32xbf16, #tpu.memory_space<vmem>>, vector<32x32xbf16>
    %cst_9 = arith.constant dense<0.000000e+00> : vector<24x32xf32>
    %10 = tpu.matmul %8, %9, %cst_9 {dimension_numbers = #tpu.dot_dimension_numbers<[1], [0], [0], [1], [0, 0, 1, 1], [], []>} : vector<24x32xbf16>, vector<32x32xbf16>, vector<24x32xf32> -> vector<24x32xf32>
    %11 = arith.truncf %6 : vector<24x32xf32> to vector<24x32xbf16>
    %c0_10 = arith.constant 0 : index
    %c0_11 = arith.constant 0 : index
    %12 = vector.load %arg5[%c0_10, %c0_11] : memref<32x32xbf16, #tpu.memory_space<vmem>>, vector<32x32xbf16>
    %cst_12 = arith.constant dense<0.000000e+00> : vector<24x32xf32>
    %13 = tpu.matmul %11, %12, %cst_12 {dimension_numbers = #tpu.dot_dimension_numbers<[1], [0], [0], [1], [0, 0, 1, 1], [], []>} : vector<24x32xbf16>, vector<32x32xbf16>, vector<24x32xf32> -> vector<24x32xf32>
    %14 = arith.addf %10, %13 : vector<24x32xf32>
    %c0_13 = arith.constant 0 : index
    %c0_14 = arith.constant 0 : index
    %15 = vector.load %arg6[%c0_13, %c0_14] : memref<1x32xf32, #tpu.memory_space<vmem>>, vector<1x32xf32>
    %16 = vector.broadcast %15 : vector<1x32xf32> to vector<24x32xf32>
    %17 = arith.addf %14, %16 : vector<24x32xf32>
    %cst_15 = arith.constant 0.000000e+00 : f32
    %18 = vector.broadcast %cst_15 : f32 to vector<8x32xf32>
    %19 = vector.extract_strided_slice %17 {offsets = [0, 0], sizes = [8, 32], strides = [1, 1]} : vector<24x32xf32> to vector<8x32xf32>
    %20 = vector.extract_strided_slice %17 {offsets = [8, 0], sizes = [8, 32], strides = [1, 1]} : vector<24x32xf32> to vector<8x32xf32>
    %21 = arith.truncf %19 : vector<8x32xf32> to vector<8x32xbf16>
    %c0_16 = arith.constant 0 : index
    %c0_17 = arith.constant 0 : index
    %22 = vector.load %arg7[%c0_16, %c0_17] : memref<32x32xbf16, #tpu.memory_space<vmem>>, vector<32x32xbf16>
    %cst_18 = arith.constant dense<0.000000e+00> : vector<8x32xf32>
    %23 = tpu.matmul %21, %22, %cst_18 {dimension_numbers = #tpu.dot_dimension_numbers<[1], [0], [0], [1], [0, 0, 1, 1], [], []>} : vector<8x32xbf16>, vector<32x32xbf16>, vector<8x32xf32> -> vector<8x32xf32>
    %24 = arith.truncf %20 : vector<8x32xf32> to vector<8x32xbf16>
    %c0_19 = arith.constant 0 : index
    %c0_20 = arith.constant 0 : index
    %25 = vector.load %arg8[%c0_19, %c0_20] : memref<32x32xbf16, #tpu.memory_space<vmem>>, vector<32x32xbf16>
    %cst_21 = arith.constant dense<0.000000e+00> : vector<8x32xf32>
    %26 = tpu.matmul %24, %25, %cst_21 {dimension_numbers = #tpu.dot_dimension_numbers<[1], [0], [0], [1], [0, 0, 1, 1], [], []>} : vector<8x32xbf16>, vector<32x32xbf16>, vector<8x32xf32> -> vector<8x32xf32>
    %27 = arith.addf %23, %26 : vector<8x32xf32>
    %c0_22 = arith.constant 0 : index
    %c0_23 = arith.constant 0 : index
    %28 = vector.load %arg9[%c0_22, %c0_23] : memref<1x32xf32, #tpu.memory_space<vmem>>, vector<1x32xf32>
    %29 = vector.broadcast %28 : vector<1x32xf32> to vector<8x32xf32>
    %30 = arith.addf %27, %29 : vector<8x32xf32>
    %cst_24 = arith.constant dense<0.000000e+00> : vector<8xf32>
    %31 = vector.multi_reduction <add>, %30, %cst_24 [1] : vector<8x32xf32> to vector<8xf32>
    %32 = vector.shape_cast %31 : vector<8xf32> to vector<8x1xf32>
    %cst_25 = arith.constant 9.99999993E-9 : f32
    %33 = vector.broadcast %cst_25 : f32 to vector<8x1xf32>
    %34 = arith.addf %32, %33 : vector<8x1xf32>
    %35 = vector.broadcast %34 : vector<8x1xf32> to vector<8x32xf32>
    %36 = arith.divf %30, %35 : vector<8x32xf32>
    %37 = arith.mulf %36, %20 : vector<8x32xf32>
    %38 = arith.addf %18, %37 : vector<8x32xf32>
    %39 = vector.extract_strided_slice %17 {offsets = [8, 0], sizes = [8, 32], strides = [1, 1]} : vector<24x32xf32> to vector<8x32xf32>
    %40 = vector.extract_strided_slice %17 {offsets = [16, 0], sizes = [8, 32], strides = [1, 1]} : vector<24x32xf32> to vector<8x32xf32>
    %41 = arith.truncf %39 : vector<8x32xf32> to vector<8x32xbf16>
    %c0_26 = arith.constant 0 : index
    %c0_27 = arith.constant 0 : index
    %42 = vector.load %arg7[%c0_26, %c0_27] : memref<32x32xbf16, #tpu.memory_space<vmem>>, vector<32x32xbf16>
    %cst_28 = arith.constant dense<0.000000e+00> : vector<8x32xf32>
    %43 = tpu.matmul %41, %42, %cst_28 {dimension_numbers = #tpu.dot_dimension_numbers<[1], [0], [0], [1], [0, 0, 1, 1], [], []>} : vector<8x32xbf16>, vector<32x32xbf16>, vector<8x32xf32> -> vector<8x32xf32>
    %44 = arith.truncf %40 : vector<8x32xf32> to vector<8x32xbf16>
    %c0_29 = arith.constant 0 : index
    %c0_30 = arith.constant 0 : index
    %45 = vector.load %arg8[%c0_29, %c0_30] : memref<32x32xbf16, #tpu.memory_space<vmem>>, vector<32x32xbf16>
    %cst_31 = arith.constant dense<0.000000e+00> : vector<8x32xf32>
    %46 = tpu.matmul %44, %45, %cst_31 {dimension_numbers = #tpu.dot_dimension_numbers<[1], [0], [0], [1], [0, 0, 1, 1], [], []>} : vector<8x32xbf16>, vector<32x32xbf16>, vector<8x32xf32> -> vector<8x32xf32>
    %47 = arith.addf %43, %46 : vector<8x32xf32>
    %c0_32 = arith.constant 0 : index
    %c0_33 = arith.constant 0 : index
    %48 = vector.load %arg9[%c0_32, %c0_33] : memref<1x32xf32, #tpu.memory_space<vmem>>, vector<1x32xf32>
    %49 = vector.broadcast %48 : vector<1x32xf32> to vector<8x32xf32>
    %50 = arith.addf %47, %49 : vector<8x32xf32>
    %cst_34 = arith.constant dense<0.000000e+00> : vector<8xf32>
    %51 = vector.multi_reduction <add>, %50, %cst_34 [1] : vector<8x32xf32> to vector<8xf32>
    %52 = vector.shape_cast %51 : vector<8xf32> to vector<8x1xf32>
    %cst_35 = arith.constant 9.99999993E-9 : f32
    %53 = vector.broadcast %cst_35 : f32 to vector<8x1xf32>
    %54 = arith.addf %52, %53 : vector<8x1xf32>
    %55 = vector.broadcast %54 : vector<8x1xf32> to vector<8x32xf32>
    %56 = arith.divf %50, %55 : vector<8x32xf32>
    %57 = arith.mulf %56, %40 : vector<8x32xf32>
    %58 = arith.addf %38, %57 : vector<8x32xf32>
    %c0_36 = arith.constant 0 : index
    %c0_37 = arith.constant 0 : index
    %c0_38 = arith.constant 0 : index
    %59 = vector.load %arg10[%c0_36, %c0_37, %c0_38] : memref<1x8x32xf32, #tpu.memory_space<vmem>>, vector<1x8x32xf32>
    %60 = vector.shape_cast %59 : vector<1x8x32xf32> to vector<8x32xf32>
    %61 = vector.shape_cast %58 : vector<8x32xf32> to vector<1x8x32xf32>
    tpu.vector_store %arg10[%c0_36, %c0_37, %c0_38], %61 {strides = array<i32>} : memref<1x8x32xf32, #tpu.memory_space<vmem>>, vector<1x8x32xf32>,
    return
  }
}

</mosaic_0001>

<bundles_post_ra>
// kernel: tpu_custom_call.1
= control target key start
LH: loop header
LB: loop body
LE: loop exit
PB: predicated region body
PF: predicated region fallthrough
CT: control target
= control target key end

     0   :  { %15 = vsyncpa [#allocation3], 0  ;;  %s1103_s0 = inlined_call_operand.hbm [shape: f32[24,32], index: 0, kind: input, shape index: {}]   ;;  %s1104_s1 = inlined_call_operand.hbm [shape: f32[24,32], index: 1, kind: input, shape index: {}]   ;;  %s1105_s2 = inlined_call_operand.hbm [shape: bf16[32,32], index: 2, kind: input, shape index: {}]   ;;  %s1106_s3 = inlined_call_operand.vmem [shape: f32[1,32], index: 3, kind: input, shape index: {}]   ;;  %s1107_s4 = inlined_call_operand.hbm [shape: bf16[32,32], index: 4, kind: input, shape index: {}]   ;;  %s1108_s5 = inlined_call_operand.vmem [shape: bf16[32,32], index: 5, kind: input, shape index: {}]   ;;  %s1109_s6 = inlined_call_operand.vmem [shape: f32[1,32], index: 6, kind: input, shape index: {}]   ;;  %s1110_s7 = inlined_call_operand.hbm [shape: bf16[32,32], index: 7, kind: input, shape index: {}]   ;;  %s1111_s8 = inlined_call_operand.hbm [shape: bf16[32,32], index: 8, kind: input, shape index: {}]   ;;  %s1112_s9 = inlined_call_operand.vmem [shape: f32[1,32], index: 9, kind: input, shape index: {}]   ;;  %s1113_s10 = inlined_call_operand.hbm [shape: f32[1,8,32], index: 10, kind: output, shape index: {}]  }
   0x1   :  { %16 = vsyncpa [#allocation6], 0 }
   0x2   :  { %17 = vsyncpa [#allocation9], 0 }
   0x3   :  { %18 = vsyncpa [#allocation12], 0 }
   0x4   :  { %19 = vsyncpa [#allocation4], 0  ;;  %s901_s13 = smov [#allocation5]   ;;  %s737_s17 = scalar_lea.hbm %s1104_s1, 384 }
   0x5   :  { %s37_s14 = sshll.u32 %s901_s13, 4  ;;  %p738_p0 = scmp.ne.s32.totalorder %s1104_s1, %s737_s17  ;;  %s38_s14 = int_to_ptr.vmem [resolvable:$true] %s37_s14 }
   0x6   :  { %p741_p1 = scmp.lt.u32.totalorder %s737_s17, %s1104_s1 }
   0x8   :  { %p743_p2 = pnand %p741_p1, %p738_p0 }
   0xa   :  { %746 = shalt.err (!%p743_p2)
}
   0xb   :  { %s747_s22 = scalar_lea.vmem %s38_s14, 384  ;;  %p752_p4 = scmp.lt.s32.totalorder %s38_s14, %s38_s14 }
   0xc   :  { %p748_p3 = scmp.ne.s32.totalorder %s38_s14, %s747_s22  ;;  %p753_p5 = scmp.lt.s32.totalorder %s747_s22, %s747_s22 }
   0xe   :  { %p754_p6 = por %p753_p5, %p752_p4 }
  0x10   :  { %p755_p7 = pnand %p754_p6, %p748_p3 }
  0x12   :  { %758 = shalt.err (!%p755_p7)
}
  0x13   :  { %s902_s23 = smov 128   ;;  %s903_s24 = smov 8  }
  0x14   :  { %43 = dma.hbm_to_vmem [thread:$0]  %s1104_s1, 384, %s38_s14, [#allocation6], %s902_s23, %s902_s23, %s903_s24  }
  0x15   :  { %s904_s27 = smov [#allocation8]   ;;  %s905_s29 = smov [#allocation2]  }
  0x16   :  { %s63_s28 = sshll.u32 %s904_s27, 4  ;;  %s25_s30 = sshll.u32 %s905_s29, 4  ;;  %s64_s28 = int_to_ptr.vmem [resolvable:$true] %s63_s28  ;;  %s26_s30 = int_to_ptr.vmem [resolvable:$true] %s25_s30 }
  0x17   :  { %s759_s13 = scalar_lea.hbm %s1107_s4, 256 }
  0x18   :  { %p760_p8 = scmp.ne.s32.totalorder %s1107_s4, %s759_s13  ;;  %p763_p9 = scmp.lt.u32.totalorder %s759_s13, %s1107_s4 }
  0x1a   :  { %p765_p10 = pnand %p763_p9, %p760_p8 }
  0x1c   :  { %768 = shalt.err (!%p765_p10)
}
  0x1d   :  { %s769_s1 = scalar_lea.vmem %s64_s28, 256  ;;  %p774_p12 = scmp.lt.s32.totalorder %s64_s28, %s64_s28 }
  0x1e   :  { %p770_p11 = scmp.ne.s32.totalorder %s64_s28, %s769_s1  ;;  %p775_p13 = scmp.lt.s32.totalorder %s769_s1, %s769_s1 }
  0x20   :  { %p776_p0 = por %p775_p13, %p774_p12 }
  0x22   :  { %p777_p1 = pnand %p776_p0, %p770_p11 }
  0x24   :  { %780 = shalt.err (!%p777_p1)
}
  0x25   :  { %s906_s14 = smov 64   ;;  %s907_s19 = smov 4  }
  0x26   :  { %69 = dma.hbm_to_vmem [thread:$0]  %s1107_s4, 256, %s64_s28, [#allocation9], %s906_s14, %s906_s14, %s907_s19  }
  0x27   :  { %s781_s26 = scalar_lea.hbm %s1103_s0, 384 }
  0x28   :  { %p782_p2 = scmp.ne.s32.totalorder %s1103_s0, %s781_s26  ;;  %p785_p3 = scmp.lt.u32.totalorder %s781_s26, %s1103_s0 }
  0x2a   :  { %p787_p4 = pnand %p785_p3, %p782_p2 }
  0x2c   :  { %790 = shalt.err (!%p787_p4)
}
  0x2d   :  { %s791_s13 = scalar_lea.vmem %s26_s30, 384  ;;  %p796_p6 = scmp.lt.s32.totalorder %s26_s30, %s26_s30 }
  0x2e   :  { %p792_p5 = scmp.ne.s32.totalorder %s26_s30, %s791_s13  ;;  %p797_p7 = scmp.lt.s32.totalorder %s791_s13, %s791_s13 }
  0x30   :  { %p798_p8 = por %p797_p7, %p796_p6 }
  0x32   :  { %p799_p9 = pnand %p798_p8, %p792_p5 }
  0x34   :  { %802 = shalt.err (!%p799_p9)
}
  0x35   :  { %31 = dma.hbm_to_vmem [thread:$0]  %s1103_s0, 384, %s26_s30, [#allocation3], %s902_s23, %s902_s23, %s903_s24  }
  0x36   :  { %s908_s15 = smov [#allocation7]   ;;  %s909_s17 = smov [#allocation10]  }
  0x37   :  { %s49_s16 = sshll.u32 %s908_s15, 4  ;;  %s79_s18 = sshll.u32 %s909_s17, 4  ;;  %s50_s16 = int_to_ptr.vmem [resolvable:$true] %s49_s16  ;;  %s80_s18 = int_to_ptr.vmem [resolvable:$true] %s79_s18 }
  0x38   :  { %s803_s21 = scalar_lea.hbm %s1105_s2, 256 }
  0x39   :  { %p804_p10 = scmp.ne.s32.totalorder %s1105_s2, %s803_s21  ;;  %p807_p11 = scmp.lt.u32.totalorder %s803_s21, %s1105_s2 }
  0x3b   :  { %p809_p12 = pnand %p807_p11, %p804_p10 }
  0x3d   :  { %812 = shalt.err (!%p809_p12)
}
  0x3e   :  { %s813_s0 = scalar_lea.vmem %s50_s16, 256  ;;  %p818_p0 = scmp.lt.s32.totalorder %s50_s16, %s50_s16 }
  0x3f   :  { %p814_p13 = scmp.ne.s32.totalorder %s50_s16, %s813_s0  ;;  %p819_p1 = scmp.lt.s32.totalorder %s813_s0, %s813_s0 }
  0x41   :  { %p820_p2 = por %p819_p1, %p818_p0 }
  0x43   :  { %p821_p3 = pnand %p820_p2, %p814_p13 }
  0x45   :  { %824 = shalt.err (!%p821_p3)
}
  0x46   :  { %55 = dma.hbm_to_vmem [thread:$0]  %s1105_s2, 256, %s50_s16, [#allocation6], %s906_s14, %s906_s14, %s907_s19  }
  0x47   :  { %s825_s11 = scalar_lea.hbm %s1110_s7, 256 }
  0x48   :  { %p826_p4 = scmp.ne.s32.totalorder %s1110_s7, %s825_s11  ;;  %p829_p5 = scmp.lt.u32.totalorder %s825_s11, %s1110_s7 }
  0x4a   :  { %p831_p6 = pnand %p829_p5, %p826_p4 }
  0x4c   :  { %834 = shalt.err (!%p831_p6)
}
  0x4d   :  { %s835_s15 = scalar_lea.vmem %s80_s18, 256  ;;  %p840_p8 = scmp.lt.s32.totalorder %s80_s18, %s80_s18 }
  0x4e   :  { %p836_p7 = scmp.ne.s32.totalorder %s80_s18, %s835_s15  ;;  %p841_p9 = scmp.lt.s32.totalorder %s835_s15, %s835_s15 }
  0x50   :  { %p842_p10 = por %p841_p9, %p840_p8 }
  0x52   :  { %p843_p11 = pnand %p842_p10, %p836_p7 }
  0x54   :  { %846 = shalt.err (!%p843_p11)
}
  0x55   :  { %85 = dma.hbm_to_vmem [thread:$0]  %s1110_s7, 256, %s80_s18, [#allocation9], %s906_s14, %s906_s14, %s907_s19  }
  0x56   :  { %s910_s17 = smov [#allocation11]   ;;  %s847_s22 = scalar_lea.hbm %s1111_s8, 256 }
  0x57   :  { %s91_s1 = sshll.u32 %s910_s17, 4  ;;  %p848_p12 = scmp.ne.s32.totalorder %s1111_s8, %s847_s22  ;;  %s92_s1 = int_to_ptr.vmem [resolvable:$true] %s91_s1 }
  0x58   :  { %p851_p13 = scmp.lt.u32.totalorder %s847_s22, %s1111_s8 }
  0x5a   :  { %p853_p0 = pnand %p851_p13, %p848_p12 }
  0x5c   :  { %856 = shalt.err (!%p853_p0)
}
  0x5d   :  { %s857_s23 = scalar_lea.vmem %s92_s1, 256  ;;  %p862_p2 = scmp.lt.s32.totalorder %s92_s1, %s92_s1 }
  0x5e   :  { %p858_p1 = scmp.ne.s32.totalorder %s92_s1, %s857_s23  ;;  %p863_p3 = scmp.lt.s32.totalorder %s857_s23, %s857_s23 }
  0x60   :  { %p864_p4 = por %p863_p3, %p862_p2 }
  0x62   :  { %p865_p5 = pnand %p864_p4, %p858_p1 }
  0x64   :  { %868 = shalt.err (!%p865_p5)
}
  0x65   :  { %97 = dma.hbm_to_vmem [thread:$0]  %s1111_s8, 256, %s92_s1, [#allocation12], %s906_s14, %s906_s14, %s907_s19  }
  0x66   :  { %891 = dma.done.wait [#allocation3], 384  }
  0x67   :  { %892 = vsyncadd [#allocation3], 4294966912 }
  0x68   :  { %893 = dma.done.wait [#allocation6], 640  }
  0x69   :  { %894 = vsyncadd [#allocation6], 4294966656 }
  0x6a   :  { %895 = dma.done.wait [#allocation9], 512  }
  0x6b   :  { %896 = vsyncadd [#allocation9], 4294966784 }
  0x6c   :  { %897 = dma.done.wait [#allocation12], 256  }
  0x6d   :  { %898 = vsyncadd [#allocation12], 4294967040  ;;  %v723_v0 = vld [vmem:[#allocation7] sm:$0xff]   ;;  %v724_v1 = vld [vmem:[#allocation7 + $0x8] sm:$0xff]   ;;  %vm147_vm0 = vcmask 261120   ;;  %v911_v31 = vmov 0.0  }
  0x6e   :  { %654 = vmatprep.subr.bf16.mxu0 %v723_v0  ;;  %v119_v2 = vld [vmem:[#allocation5] sm:$0xff]  ;;  %v120_v3 = vld [vmem:[#allocation5 + $0x8] sm:$0xff]  ;;  %v121_v4 = vld [vmem:[#allocation5 + $0x10] sm:$0xff]  ;;  %vm912_vm1 = vmmov 0  }
  0x6f   :  { %655 = vmatpush3.bf16.msra.mxu0 %v723_v0  ;;  %v122_v5 = vpack.c.bf16 %v120_v3, %v119_v2  ;;  %v725_v6 = vld [vmem:[#allocation8] sm:$0xff]   ;;  %v123_v7 = vpack.c.bf16 %v121_v4, %v121_v4  ;;  %v727_v9 = vld [vmem:[#allocation8 + $0x8] sm:$0xff]   ;;  %v204_v14 = vld [vmem:[#allocation2 + $0x10] sm:$0xff] }
  0x70   :  { %656 = vmatprep.subr.bf16.mxu0 %v724_v1  ;;  %v726_v8 = vld [vmem:[%s1108_s5] sm:$0xff]   ;;  %v203_v11 = vld [vmem:[#allocation2 + $0x8] sm:$0xff]  ;;  %v206_v15 = vpack.c.bf16 %v204_v14, %v204_v14  ;;  %v729_v29 = vld [vmem:[#allocation10] sm:$0xff]  }
  0x71   :  { %658 = vmatprep.mubr.msk.bf16.mxu0 %vm147_vm0, %v122_v5  ;;  %662 = vmatprep.subr.bf16.mxu1 %v726_v8  ;;  %v202_v10 = vld [vmem:[#allocation2] sm:$0xff]  ;;  %v728_v12 = vld [vmem:[%s1108_s5 + $0x8] sm:$0xff]   ;;  %v731_v33 = vld [vmem:[#allocation10 + $0x8] sm:$0xff]  }
  0x72   :  { %663 = vmatpush3.bf16.msra.mxu1 %v726_v8  ;;  %v205_v13 = vpack.c.bf16 %v203_v11, %v202_v10  ;;  %v607_v17 = vld [vmem:[%s1106_s3] ss:$0 sm:$0xff]  ;;  %v732_v34 = vld [vmem:[#allocation11 + $0x8] sm:$0xff]  }
  0x73   :  { %657 = vmatpush3.bf16.msra.mxu0 %v724_v1  ;;  %664 = vmatprep.subr.bf16.mxu1 %v728_v12  ;;  %v730_v32 = vld [vmem:[#allocation11] sm:$0xff]  }
  0x74   :  { %670 = vmatprep.subr.bf16.mxu0 %v725_v6  ;;  %v620_v37 = vld [vmem:[%s1109_s6] ss:$0 sm:$0xff] }
  0x75   :  { %v627_v53 = vld [vmem:[%s1112_s9] ss:$0 sm:$0xff]  ;;  %s913_s9 = smov [#allocation13]  }
  0x76   :  { %659 = vmatmul.mubr.msk.bf16.vlgmr.msra.gmra.mrb[0].mxu0 %vm147_vm0, %v123_v7  ;;  %665 = vmatpush3.bf16.msra.mxu1 %v728_v12  ;;  %s595_s12 = sshll.u32 %s913_s9, 4  ;;  %s596_s12 = int_to_ptr.vmem [resolvable:$true] %s595_s12 }
  0x77   :  { %671 = vmatpush3.bf16.msra.mxu0 %v725_v6  ;;  %674 = vmatprep.mubr.msk.bf16.mxu0 %vm147_vm0, %v205_v13  ;;  %s869_s13 = scalar_lea.vmem %s596_s12, 128  ;;  %p874_p7 = scmp.lt.s32.totalorder %s596_s12, %s596_s12 }
  0x78   :  { %672 = vmatprep.subr.bf16.mxu0 %v727_v9  ;;  %678 = vmatprep.subr.bf16.mxu1 %v911_v31  ;;  %p870_p6 = scmp.ne.s32.totalorder %s596_s12, %s869_s13  ;;  %p875_p8 = scmp.lt.s32.totalorder %s869_s13, %s869_s13 }
  0x7a   :  { %p876_p9 = por %p875_p8, %p874_p7 }
  0x7b   :  { %673 = vmatpush3.bf16.msra.mxu0 %v727_v9 }
  0x7c   :  { %686 = vmatprep.subr.bf16.mxu0 %v911_v31  ;;  %p877_p10 = pnand %p876_p9, %p870_p6 }
  0x7e   :  { %675 = vmatmul.mubr.msk.bf16.vlgmr.msra.gmra.mrb[4].mxu0 %vm147_vm0, %v206_v15 }
  0x7f   :  { %687 = vmatpush3.bf16.msra.mxu0 %v729_v29  ;;  %690 = vmatprep.mubr.msk.bf16.mxu0 %vm912_vm1, %v911_v31 }
  0x80   :  { %688 = vmatprep.subr.bf16.mxu0 %v911_v31 }
  0x83   :  { %689 = vmatpush3.bf16.msra.mxu0 %v731_v33 }
  0x84   :  { %702 = vmatprep.subr.bf16.mxu0 %v911_v31 }
 0x149   :  { %v660_v16 = vpop.f32.mrb[0].mxu0 }
 0x14a   :  { %v188_v18 = vpop.f32.mrb[1].mxu0  ;;  %v197_v20 = vadd.f32 %v660_v16, %v607_v17 }
 0x14b   :  { %v661_v19 = vpop.f32.mrb[2].mxu0  ;;  %v189_v22 = vadd.f32 %v607_v17, %v188_v18 }
 0x14c   :  { %v191_v21 = vpop.f32.mrb[3].mxu0  ;;  %v212_v25 = vpack.c.bf16 %v197_v20, %v197_v20 }
 0x14d   :  { %v192_v23 = vadd.f32 %v607_v17, %v191_v21 }
 0x14f   :  { %v211_v24 = vpack.c.bf16 %v192_v23, %v189_v22 }
 0x151   :  { %666 = vmatprep.mubr.msk.bf16.mxu1 %vm147_vm0, %v211_v24  ;;  %v676_v26 = vpop.f32.mrb[4].mxu0 }
 0x152   :  { %667 = vmatmul.mubr.msk.bf16.vlgmr.msra.gmra.mrb[0].mxu1 %vm147_vm0, %v212_v25  ;;  %v335_v27 = vpop.f32.mrb[5].mxu0 }
 0x153   :  { %v677_v28 = vpop.f32.mrb[6].mxu0  ;;  %679 = vmatpush3.bf16.msra.mxu1 %v730_v32  ;;  %682 = vmatprep.mubr.msk.bf16.mxu1 %vm912_vm1, %v911_v31 }
 0x154   :  { %v338_v30 = vpop.f32.mrb[7].mxu0  ;;  %680 = vmatprep.subr.bf16.mxu1 %v911_v31 }
 0x157   :  { %681 = vmatpush3.bf16.msra.mxu1 %v732_v34 }
 0x158   :  { %694 = vmatprep.subr.bf16.mxu1 %v911_v31 }
 0x225   :  { %v668_v35 = vpop.f32.mrb[0].mxu1 }
 0x226   :  { %v344_v36 = vadd.f32 %v676_v26, %v668_v35  ;;  %v269_v38 = vpop.f32.mrb[1].mxu1 }
 0x227   :  { %v336_v39 = vadd.f32 %v335_v27, %v269_v38  ;;  %v669_v40 = vpop.f32.mrb[2].mxu1 }
 0x228   :  { %v272_v41 = vpop.f32.mrb[3].mxu1  ;;  %v358_v47 = vadd.f32 %v620_v37, %v344_v36 }
 0x229   :  { %v356_v42 = vadd.f32 %v620_v37, %v336_v39  ;;  %v339_v43 = vadd.f32 %v338_v30, %v272_v41 }
 0x22a   :  { %v495_v48 = vpack.c.bf16 %v358_v47, %v358_v47 }
 0x22b   :  { %v359_v44 = vpack.c.bf16 %v356_v42, %v356_v42  ;;  %v357_v45 = vadd.f32 %v620_v37, %v339_v43 }
 0x22d   :  { %v364_v46 = vpack.c.bf16 %v357_v45, %v357_v45  ;;  %691 = vmatmul.mubr.msk.bf16.vlgmr.msra.gmra.mrb[8].mxu0 %vm147_vm0, %v359_v44 }
 0x22e   :  { %703 = vmatpush3.bf16.msra.mxu0 %v729_v29  ;;  %706 = vmatprep.mubr.msk.bf16.mxu0 %vm912_vm1, %v911_v31 }
 0x22f   :  { %683 = vmatmul.mubr.msk.bf16.vlgmr.msra.gmra.mrb[4].mxu1 %vm147_vm0, %v364_v46  ;;  %704 = vmatprep.subr.bf16.mxu0 %v911_v31 }
 0x230   :  { %695 = vmatpush3.bf16.msra.mxu1 %v730_v32  ;;  %698 = vmatprep.mubr.msk.bf16.mxu1 %vm912_vm1, %v911_v31 }
 0x231   :  { %696 = vmatprep.subr.bf16.mxu1 %v911_v31 }
 0x232   :  { %705 = vmatpush3.bf16.msra.mxu0 %v731_v33 }
 0x234   :  { %697 = vmatpush3.bf16.msra.mxu1 %v732_v34 }
 0x235   :  { %707 = vmatmul.mubr.msk.bf16.vlgmr.msra.gmra.mrb[12].mxu0 %vm147_vm0, %v364_v46 }
 0x237   :  { %699 = vmatmul.mubr.msk.bf16.vlgmr.msra.gmra.mrb[8].mxu1 %vm147_vm0, %v495_v48 }
 0x300   :  { %v473_v49 = vpop.f32.mrb[8].mxu0 }
 0x301   :  { %v692_v50 = vpop.f32.mrb[9].mxu0 }
 0x302   :  { %v418_v51 = vpop.f32.mrb[4].mxu1  ;;  %v476_v52 = vpop.f32.mrb[10].mxu0 }
 0x303   :  { %v474_v54 = vadd.f32 %v473_v49, %v418_v51  ;;  %v684_v55 = vpop.f32.mrb[5].mxu1  ;;  %v693_v56 = vpop.f32.mrb[11].mxu0 }
 0x304   :  { %v421_v57 = vpop.f32.mrb[6].mxu1 }
 0x305   :  { %v685_v58 = vpop.f32.mrb[7].mxu1  ;;  %v486_v59 = vadd.f32 %v627_v53, %v474_v54 }
 0x307   :  { %v487_v60 = vsel %vm147_vm0, %v486_v59, 0.0 }
 0x308   :  { %v573_v61 = vpop.f32.mrb[12].mxu0  ;;  %488 = vadd.xlane.f32.xlu0 %v487_v60 }
 0x309   :  { %v708_v62 = vpop.f32.mrb[13].mxu0 }
 0x30a   :  { %v533_v63 = vpop.f32.mrb[8].mxu1  ;;  %v576_v0 = vpop.f32.mrb[14].mxu0 }
 0x30b   :  { %v574_v1 = vadd.f32 %v573_v61, %v533_v63  ;;  %v700_v2 = vpop.f32.mrb[9].mxu1  ;;  %v709_v3 = vpop.f32.mrb[15].mxu0 }
 0x30c   :  { %v536_v4 = vpop.f32.mrb[10].mxu1 }
 0x30d   :  { %v701_v5 = vpop.f32.mrb[11].mxu1  ;;  %v579_v6 = vadd.f32 %v627_v53, %v574_v1 }
 0x30f   :  { %v580_v7 = vsel %vm147_vm0, %v579_v6, 0.0 }
 0x310   :  { %581 = vadd.xlane.f32.xlu0 %v580_v7 }
 0x395   :  { %v489_v8 = vpop.xlane.xlu0 %488 }
 0x396   :  { %v490_v9 = vadd.f32 1e-08, %v489_v8 }
 0x398   :  { %733 = vrcp.f32 %v490_v9 }
 0x39d   :  { %v582_v10 = vpop.xlane.xlu0 %581 }
 0x39e   :  { %v583_v11 = vadd.f32 1e-08, %v582_v10 }
 0x3a0   :  { %735 = vrcp.f32 %v583_v11 }
 0x3a2   :  { %v734_v12 = vpop.eup %733 }
 0x3a3   :  { %v492_v13 = vmul.f32 %v734_v12, %v486_v59 }
 0x3a5   :  { %v493_v16 = vmul.f32 %v492_v13, %v357_v45 }
 0x3aa   :  { %v736_v14 = vpop.eup %735 }
 0x3ab   :  { %v585_v15 = vmul.f32 %v736_v14, %v579_v6 }
 0x3ad   :  { %v586_v17 = vmul.f32 %v585_v15, %v358_v47 }
 0x3af   :  { %v587_v18 = vadd.f32 %v586_v17, %v493_v16 }
 0x3b1   :  { %588 = vst.msk [vmem:[#allocation13] sm:$0xff] %vm147_vm0, %v587_v18 }
 0x3b2   :  { %880 = shalt.err (!%p877_p10)
}
 0x3b3   :  { %s881_s15 = scalar_lea.hbm %s1113_s10, 128 }
 0x3b4   :  { %p882_p11 = scmp.ne.s32.totalorder %s1113_s10, %s881_s15  ;;  %p885_p12 = scmp.lt.u32.totalorder %s881_s15, %s1113_s10 }
 0x3b6   :  { %p887_p13 = pnand %p885_p12, %p882_p11 }
 0x3b8   :  { %890 = shalt.err (!%p887_p13)
}
 0x3b9   :  { %598 = dma.vmem_to_hbm [thread:$0]  %s596_s12, 128, %s1113_s10, [#allocation4]  }
 0x3ba   :  { %899 = dma.done.wait [#allocation4], 128  }
 0x3bb   :  { %900 = vsyncadd [#allocation4], 4294967168 }
 0x3bc   :  { %602 = vsyncpa [#allocation3], 1 }
 0x3bd   :  { %603 = vsyncpa [#allocation6], 1 }
 0x3be   :  { %604 = vsyncpa [#allocation9], 1 }
 0x3bf   :  { %605 = vsyncpa [#allocation12], 1 }
 0x3c0   :  { %606 = vsyncpa [#allocation4], 1 }

</bundles_post_ra>
